<compile_context>
chip_gen: v5e
topology: v5e:2x2
jax: 0.10.0
libtpu: 0.0.40
codegen_flags: <defaults>
</compile_context>

<pallas_src>
import numpy as np

import jax
import jax.numpy as jnp
from jax.experimental import pallas as pl
from jax.experimental.pallas import tpu as pltpu


def _upsampling_kernel(x_ref, rb_ref, vs_ref, tb_ref, mc_ref, b1_ref, b2_ref, o_ref):
    # x_ref : (NB*H, W)          f32   NB input images stacked along rows
    # rb_ref: (3, NB*Hu, NB*H)   bf16  block-diag row selectors (upsample + conv1 row taps + row pad)
    # vs_ref: (3*W, L)           bf16  conv1 width taps + col upsample/pad + channel expand, ki-stacked
    # tb_ref: (3, NB*Hu, NB*Hu)  bf16  block-diag conv2 row taps (+ final row pad)
    # mc_ref: (L, 3*Wu)          bf16  conv2 width taps + channel contraction (+ final col pad), ki-concat
    # b1_ref: (1, L)             f32   conv1 bias, lane resident, tiled over columns
    # b2_ref: (1, 1) in SMEM     f32   conv2 bias (scalar)
    # o_ref : (NB*Hu, Wu)        f32   NB output images stacked along rows
    Wu = o_ref.shape[-1]

    xb = x_ref[...].astype(jnp.bfloat16)                                  # (NB*H, W)

    # ---- stage 1: upsample + conv1(1->32, 3x3, valid) + ReLU + ReplicationPad2d(1) ----
    # hp[p', q'*C1+c] = relu(b1[c] + sum_{ki,kj} w1[c,ki,kj] * x[(cl(p')+ki)//2, (cl(q')+kj)//2])
    # = relu(b1 + [R0@x | R1@x | R2@x] @ Vstack): ki-sum done inside one K=3W matmul.
    xr = [jnp.dot(rb_ref[ki], xb, preferred_element_type=jnp.float32) for ki in range(3)]
    xcat = jnp.concatenate(xr, axis=1).astype(jnp.bfloat16)               # (NB*Hu, 3W)
    t1 = jnp.dot(xcat, vs_ref[...], preferred_element_type=jnp.float32)   # (NB*Hu, L)
    hp = jnp.maximum(t1 + b1_ref[...], 0.0).astype(jnp.bfloat16)          # lane-dense, channel-last

    # ---- stage 2: conv2(32->1, 3x3, valid) + ReplicationPad2d(1) ----
    # y[:, ki*Wu:(ki+1)*Wu] = hp @ M[ki]   (single wide matmul), then
    # out = b2 + sum_ki T[ki] @ y_ki       (tiny selector matmuls + VPU adds).
    y = jnp.dot(hp, mc_ref[...], preferred_element_type=jnp.float32)      # (NB*Hu, 3*Wu)
    acc = None
    for ki in range(3):
        yk = y[:, ki * Wu:(ki + 1) * Wu].astype(jnp.bfloat16)             # (NB*Hu, Wu)
        part = jnp.dot(tb_ref[ki], yk, preferred_element_type=jnp.float32)
        acc = part if acc is None else acc + part

    o_ref[...] = acc + b2_ref[0, 0]


def _pick_nb(N, H, Hu, target_rows=256):
    """Images per grid step: fill ~256 MXU rows, keep >=2 grid steps if possible."""
    nb_max = max(1, min(N, max(1, target_rows // Hu)))
    ok = []
    for d in range(1, N + 1):
        if N % d:
            continue
        # blocks must keep the second-to-last dim 8-aligned (or cover the full dim)
        aligned = (d == N) or ((d * H) % 8 == 0 and (d * Hu) % 8 == 0)
        if aligned and d <= nb_max:
            ok.append(d)
    if not ok:
        return N
    two_steps = [d for d in ok if N // d >= 2]
    return max(two_steps) if two_steps else max(ok)


@jax.jit
def upsampling_layer_forward(x, w1, b1, w2, b2):
    """x: (N, 1, H, W) f32. Returns (N, 1, 2H, 2W) f32."""
    N, C, H, W = x.shape
    assert C == 1, "conv1 expects a single input channel"
    Hu, Wu = 2 * H, 2 * W
    Ho, Wo = Hu - 2, Wu - 2
    C1 = w1.shape[0]                      # 32
    L = Wu * C1                           # lane width of the conv1 intermediate (1024)
    NB = _pick_nb(N, H, Hu)
    steps = N // NB

    # ---------- static selection patterns (numpy, trace-time constants) ----------
    clr = np.clip(np.arange(Hu) - 1, 0, Ho - 1)     # row clamp of ReplicationPad2d
    clc = np.clip(np.arange(Wu) - 1, 0, Wo - 1)     # col clamp of ReplicationPad2d
    ks = np.arange(3)
    rows = np.arange(Hu)
    cols = np.arange(Wu)

    # R[ki, p', i] = 1  iff  i == (clr[p'] + ki) // 2   (2x row-upsample + row-pad of conv1)
    R = np.zeros((3, Hu, H), np.float32)
    R[ks[:, None], rows[None, :], (clr[None, :] + ks[:, None]) // 2] = 1.0
    # T[ki, p', r] = 1  iff  r == clr[p'] + ki          (conv2 row taps + final row-pad)
    T = np.zeros((3, Hu, Hu), np.float32)
    T[ks[:, None], rows[None, :], clr[None, :] + ks[:, None]] = 1.0
    # A[q', kj, j] = 1  iff  j == (clc[q'] + kj) // 2   (2x col-upsample + col-pad of conv1)
    A = np.zeros((Wu, 3, W), np.float32)
    A[cols[:, None], ks[None, :], (clc[:, None] + ks[None, :]) // 2] = 1.0
    # B[q', kj, r] = 1  iff  r == clc[q'] + kj          (conv2 col taps + final col-pad)
    Bm = np.zeros((Wu, 3, Wu), np.float32)
    Bm[cols[:, None], ks[None, :], clc[:, None] + ks[None, :]] = 1.0

    # Block-diagonal batched row selectors (exact 0/1 -> bf16 lossless).
    eye = np.eye(NB, dtype=np.float32)
    Rb = jnp.asarray(np.stack([np.kron(eye, R[k]) for k in range(3)])).astype(jnp.bfloat16)
    Tb = jnp.asarray(np.stack([np.kron(eye, T[k]) for k in range(3)])).astype(jnp.bfloat16)

    # ---------- weight-dependent matmul operands (tiny one-time einsums) ----------
    hi = jax.lax.Precision.HIGHEST
    w1f = w1.astype(jnp.float32)          # (C1, 1, 3, 3)
    w2f = w2.astype(jnp.float32)          # (1, C1, 3, 3)
    # Vstack[ki*W + j, q'*C1 + c] = sum_{kj: (clc[q']+kj)//2 == j} w1[c, 0, ki, kj]
    Vstack = jnp.einsum("qkj,cik->ijqc", A, w1f[:, 0],
                        precision=hi).reshape(3 * W, L).astype(jnp.bfloat16)
    # Mcat[r*C1 + c, ki*Wu + q'] = sum_{kj: clc[q']+kj == r} w2[0, c, ki, kj]
    Mcat = jnp.einsum("qkr,cik->rciq", Bm, w2f[0],
                      precision=hi).reshape(L, 3 * Wu).astype(jnp.bfloat16)
    B1 = jnp.tile(b1.astype(jnp.float32), Wu).reshape(1, L)      # lane-resident bias
    b2c = b2.reshape(1, 1).astype(jnp.float32)                   # scalar -> SMEM

    # Images stacked along the matmul M dimension.
    x2d = x[:, 0].astype(jnp.float32).reshape(N * H, W)

    # Advisory cost estimate so XLA can overlap this latency-bound call.
    macs_per_step = (3 * (NB * Hu) * (NB * H) * W            # row selectors
                     + (NB * Hu) * (3 * W) * L               # stage-1 wide matmul
                     + (NB * Hu) * L * (3 * Wu)              # stage-2 wide matmul
                     + 3 * (NB * Hu) * (NB * Hu) * Wu)       # conv2 row taps
    const_bytes = 2 * (Rb.size + Tb.size + Vstack.size + Mcat.size) + 4 * L + 4
    cost = pl.CostEstimate(
        flops=int(2 * steps * macs_per_step),
        transcendentals=0,
        bytes_accessed=int(4 * N * (H * W + Hu * Wu) + const_bytes),
    )

    out = pl.pallas_call(
        _upsampling_kernel,
        out_shape=jax.ShapeDtypeStruct((N * Hu, Wu), jnp.float32),
        grid=(steps,),
        in_specs=[
            pl.BlockSpec((NB * H, W), lambda b: (b, 0)),
            pl.BlockSpec((3, NB * Hu, NB * H), lambda b: (0, 0, 0)),
            pl.BlockSpec((3 * W, L), lambda b: (0, 0)),
            pl.BlockSpec((3, NB * Hu, NB * Hu), lambda b: (0, 0, 0)),
            pl.BlockSpec((L, 3 * Wu), lambda b: (0, 0)),
            pl.BlockSpec((1, L), lambda b: (0, 0)),
            pl.BlockSpec(memory_space=pltpu.MemorySpace.SMEM),
        ],
        out_specs=pl.BlockSpec((NB * Hu, Wu), lambda b: (b, 0)),
        compiler_params=pltpu.CompilerParams(
            dimension_semantics=("parallel",)),
        cost_estimate=cost,
    )(x2d, Rb, Vstack, Tb, Mcat, B1, b2c)

    return out.reshape(N, 1, Hu, Wu)


def _reference_forward(x, w1, b1, w2, b2):
    """Pure-JAX reference mirroring the PyTorch module (high-precision ground truth)."""
    hi = jax.lax.Precision.HIGHEST
    up = jnp.repeat(jnp.repeat(x, 2, axis=2), 2, axis=3)
    dn = ("NCHW", "OIHW", "NCHW")
    y = jax.lax.conv_general_dilated(up, w1, (1, 1), "VALID",
                                     dimension_numbers=dn, precision=hi)
    y = jax.nn.relu(y + b1[None, :, None, None])
    y = jnp.pad(y, ((0, 0), (0, 0), (1, 1), (1, 1)), mode="edge")
    y = jax.lax.conv_general_dilated(y, w2, (1, 1), "VALID",
                                     dimension_numbers=dn, precision=hi)
    y = y + b2[None, :, None, None]
    y = jnp.pad(y, ((0, 0), (0, 0), (1, 1), (1, 1)), mode="edge")
    return y


if __name__ == "__main__":
    key = jax.random.PRNGKey(0)
    k_x, k_w1, k_b1, k_w2, k_b2 = jax.random.split(key, 5)

    N, C, H, W = 2, 1, 16, 16
    x = jax.random.normal(k_x, (N, C, H, W), dtype=jnp.float32)

    # Torch-like uniform(-1/sqrt(fan_in), 1/sqrt(fan_in)) init.
    bound1 = 1.0 / (1 * 3 * 3) ** 0.5
    w1 = jax.random.uniform(k_w1, (32, 1, 3, 3), jnp.float32, -bound1, bound1)
    b1 = jax.random.uniform(k_b1, (32,), jnp.float32, -bound1, bound1)
    bound2 = 1.0 / (32 * 3 * 3) ** 0.5
    w2 = jax.random.uniform(k_w2, (1, 32, 3, 3), jnp.float32, -bound2, bound2)
    b2 = jax.random.uniform(k_b2, (1,), jnp.float32, -bound2, bound2)

    out = jax.block_until_ready(upsampling_layer_forward(x, w1, b1, w2, b2))
    ref = jax.block_until_ready(_reference_forward(x, w1, b1, w2, b2))

    assert out.shape == (N, 1, 2 * H, 2 * W), out.shape
    # Kernel matmuls run in bf16 on the MXU (f32 accumulation), the reference
    # at Precision.HIGHEST; tolerance is sized for that gap.
    err = float(jnp.max(jnp.abs(out - ref)))
    assert err < 3e-2, f"max abs error {err}"
    print("KERNEL_OK")
</pallas_src>

<mosaic_0001>
module attributes {stable_mosaic.version = 11 : i64} {
  func.func @_upsampling_kernel(%arg0: i32, %arg1: memref<16x16xf32, #tpu.memory_space<vmem>>, %arg2: memref<3x32x16xbf16, #tpu.memory_space<vmem>>, %arg3: memref<48x1024xbf16, #tpu.memory_space<vmem>>, %arg4: memref<3x32x32xbf16, #tpu.memory_space<vmem>>, %arg5: memref<1024x96xbf16, #tpu.memory_space<vmem>>, %arg6: memref<1x1024xf32, #tpu.memory_space<vmem>>, %arg7: memref<1x1xf32, #tpu.memory_space<smem>>, %arg8: memref<32x32xf32, #tpu.memory_space<vmem>>) attributes {dimension_semantics = [#tpu.dimension_semantics<parallel>], iteration_bounds = array<i64: 2>, scalar_prefetch = 0 : i64, scratch_operands = 0 : i64, tpu.core_type = #tpu.core_type<tc>, window_params = [{transform_indices = @transform_0, window_bounds = array<i64: 16, 16>}, {pipeline_mode = #tpu.pipeline_mode<synchronous>, transform_indices = @transform_1, window_bounds = array<i64: 3, 32, 16>}, {pipeline_mode = #tpu.pipeline_mode<synchronous>, transform_indices = @transform_2, window_bounds = array<i64: 48, 1024>}, {pipeline_mode = #tpu.pipeline_mode<synchronous>, transform_indices = @transform_3, window_bounds = array<i64: 3, 32, 32>}, {pipeline_mode = #tpu.pipeline_mode<synchronous>, transform_indices = @transform_4, window_bounds = array<i64: 1024, 96>}, {pipeline_mode = #tpu.pipeline_mode<synchronous>, transform_indices = @transform_5, window_bounds = array<i64: 1, 1024>}, {transform_indices = @transform_6, window_bounds = array<i64: 1, 1>}, {transform_indices = @transform_7, window_bounds = array<i64: 32, 32>}]} {
    %c0 = arith.constant 0 : index
    %c0_0 = arith.constant 0 : index
    %0 = vector.load %arg1[%c0, %c0_0] : memref<16x16xf32, #tpu.memory_space<vmem>>, vector<16x16xf32>
    %1 = arith.truncf %0 : vector<16x16xf32> to vector<16x16xbf16>
    %c0_1 = arith.constant 0 : index
    %c0_2 = arith.constant 0 : index
    %c0_3 = arith.constant 0 : index
    %2 = vector.load %arg2[%c0_1, %c0_2, %c0_3] : memref<3x32x16xbf16, #tpu.memory_space<vmem>>, vector<1x32x16xbf16>
    %3 = vector.shape_cast %2 : vector<1x32x16xbf16> to vector<32x16xbf16>
    %cst = arith.constant dense<0.000000e+00> : vector<32x16xf32>
    %4 = tpu.matmul %3, %1, %cst {dimension_numbers = #tpu.dot_dimension_numbers<[1], [0], [0], [1], [0, 0, 1, 1], [], []>} : vector<32x16xbf16>, vector<16x16xbf16>, vector<32x16xf32> -> vector<32x16xf32>
    %c1 = arith.constant 1 : index
    %c0_4 = arith.constant 0 : index
    %c0_5 = arith.constant 0 : index
    %5 = vector.load %arg2[%c1, %c0_4, %c0_5] : memref<3x32x16xbf16, #tpu.memory_space<vmem>>, vector<1x32x16xbf16>
    %6 = vector.shape_cast %5 : vector<1x32x16xbf16> to vector<32x16xbf16>
    %cst_6 = arith.constant dense<0.000000e+00> : vector<32x16xf32>
    %7 = tpu.matmul %6, %1, %cst_6 {dimension_numbers = #tpu.dot_dimension_numbers<[1], [0], [0], [1], [0, 0, 1, 1], [], []>} : vector<32x16xbf16>, vector<16x16xbf16>, vector<32x16xf32> -> vector<32x16xf32>
    %c2 = arith.constant 2 : index
    %c0_7 = arith.constant 0 : index
    %c0_8 = arith.constant 0 : index
    %8 = vector.load %arg2[%c2, %c0_7, %c0_8] : memref<3x32x16xbf16, #tpu.memory_space<vmem>>, vector<1x32x16xbf16>
    %9 = vector.shape_cast %8 : vector<1x32x16xbf16> to vector<32x16xbf16>
    %cst_9 = arith.constant dense<0.000000e+00> : vector<32x16xf32>
    %10 = tpu.matmul %9, %1, %cst_9 {dimension_numbers = #tpu.dot_dimension_numbers<[1], [0], [0], [1], [0, 0, 1, 1], [], []>} : vector<32x16xbf16>, vector<16x16xbf16>, vector<32x16xf32> -> vector<32x16xf32>
    %11 = tpu.concatenate %4, %7, %10 in 1 : vector<32x16xf32>, vector<32x16xf32>, vector<32x16xf32> -> vector<32x48xf32>
    %12 = arith.truncf %11 : vector<32x48xf32> to vector<32x48xbf16>
    %c0_10 = arith.constant 0 : index
    %c0_11 = arith.constant 0 : index
    %13 = vector.load %arg3[%c0_10, %c0_11] : memref<48x1024xbf16, #tpu.memory_space<vmem>>, vector<48x1024xbf16>
    %cst_12 = arith.constant dense<0.000000e+00> : vector<32x1024xf32>
    %14 = tpu.matmul %12, %13, %cst_12 {dimension_numbers = #tpu.dot_dimension_numbers<[1], [0], [0], [1], [0, 0, 1, 1], [], []>} : vector<32x48xbf16>, vector<48x1024xbf16>, vector<32x1024xf32> -> vector<32x1024xf32>
    %c0_13 = arith.constant 0 : index
    %c0_14 = arith.constant 0 : index
    %15 = vector.load %arg6[%c0_13, %c0_14] : memref<1x1024xf32, #tpu.memory_space<vmem>>, vector<1x1024xf32>
    %16 = vector.broadcast %15 : vector<1x1024xf32> to vector<32x1024xf32>
    %17 = arith.addf %14, %16 : vector<32x1024xf32>
    %cst_15 = arith.constant 0.000000e+00 : f32
    %18 = vector.broadcast %cst_15 : f32 to vector<32x1024xf32>
    %19 = arith.maximumf %17, %18 : vector<32x1024xf32>
    %20 = arith.truncf %19 : vector<32x1024xf32> to vector<32x1024xbf16>
    %c0_16 = arith.constant 0 : index
    %c0_17 = arith.constant 0 : index
    %21 = vector.load %arg5[%c0_16, %c0_17] : memref<1024x96xbf16, #tpu.memory_space<vmem>>, vector<1024x96xbf16>
    %cst_18 = arith.constant dense<0.000000e+00> : vector<32x96xf32>
    %22 = tpu.matmul %20, %21, %cst_18 {dimension_numbers = #tpu.dot_dimension_numbers<[1], [0], [0], [1], [0, 0, 1, 1], [], []>} : vector<32x1024xbf16>, vector<1024x96xbf16>, vector<32x96xf32> -> vector<32x96xf32>
    %23 = vector.extract_strided_slice %22 {offsets = [0, 0], sizes = [32, 32], strides = [1, 1]} : vector<32x96xf32> to vector<32x32xf32>
    %24 = arith.truncf %23 : vector<32x32xf32> to vector<32x32xbf16>
    %c0_19 = arith.constant 0 : index
    %c0_20 = arith.constant 0 : index
    %c0_21 = arith.constant 0 : index
    %25 = vector.load %arg4[%c0_19, %c0_20, %c0_21] : memref<3x32x32xbf16, #tpu.memory_space<vmem>>, vector<1x32x32xbf16>
    %26 = vector.shape_cast %25 : vector<1x32x32xbf16> to vector<32x32xbf16>
    %cst_22 = arith.constant dense<0.000000e+00> : vector<32x32xf32>
    %27 = tpu.matmul %26, %24, %cst_22 {dimension_numbers = #tpu.dot_dimension_numbers<[1], [0], [0], [1], [0, 0, 1, 1], [], []>} : vector<32x32xbf16>, vector<32x32xbf16>, vector<32x32xf32> -> vector<32x32xf32>
    %28 = vector.extract_strided_slice %22 {offsets = [0, 32], sizes = [32, 32], strides = [1, 1]} : vector<32x96xf32> to vector<32x32xf32>
    %29 = arith.truncf %28 : vector<32x32xf32> to vector<32x32xbf16>
    %c1_23 = arith.constant 1 : index
    %c0_24 = arith.constant 0 : index
    %c0_25 = arith.constant 0 : index
    %30 = vector.load %arg4[%c1_23, %c0_24, %c0_25] : memref<3x32x32xbf16, #tpu.memory_space<vmem>>, vector<1x32x32xbf16>
    %31 = vector.shape_cast %30 : vector<1x32x32xbf16> to vector<32x32xbf16>
    %cst_26 = arith.constant dense<0.000000e+00> : vector<32x32xf32>
    %32 = tpu.matmul %31, %29, %cst_26 {dimension_numbers = #tpu.dot_dimension_numbers<[1], [0], [0], [1], [0, 0, 1, 1], [], []>} : vector<32x32xbf16>, vector<32x32xbf16>, vector<32x32xf32> -> vector<32x32xf32>
    %33 = arith.addf %27, %32 : vector<32x32xf32>
    %34 = vector.extract_strided_slice %22 {offsets = [0, 64], sizes = [32, 32], strides = [1, 1]} : vector<32x96xf32> to vector<32x32xf32>
    %35 = arith.truncf %34 : vector<32x32xf32> to vector<32x32xbf16>
    %c2_27 = arith.constant 2 : index
    %c0_28 = arith.constant 0 : index
    %c0_29 = arith.constant 0 : index
    %36 = vector.load %arg4[%c2_27, %c0_28, %c0_29] : memref<3x32x32xbf16, #tpu.memory_space<vmem>>, vector<1x32x32xbf16>
    %37 = vector.shape_cast %36 : vector<1x32x32xbf16> to vector<32x32xbf16>
    %cst_30 = arith.constant dense<0.000000e+00> : vector<32x32xf32>
    %38 = tpu.matmul %37, %35, %cst_30 {dimension_numbers = #tpu.dot_dimension_numbers<[1], [0], [0], [1], [0, 0, 1, 1], [], []>} : vector<32x32xbf16>, vector<32x32xbf16>, vector<32x32xf32> -> vector<32x32xf32>
    %39 = arith.addf %33, %38 : vector<32x32xf32>
    %c0_31 = arith.constant 0 : index
    %c0_32 = arith.constant 0 : index
    %40 = memref.load %arg7[%c0_31, %c0_32] : memref<1x1xf32, #tpu.memory_space<smem>>
    %41 = vector.broadcast %40 : f32 to vector<32x32xf32>
    %42 = arith.addf %39, %41 : vector<32x32xf32>
    %c0_33 = arith.constant 0 : index
    %c0_34 = arith.constant 0 : index
    %43 = vector.load %arg8[%c0_33, %c0_34] : memref<32x32xf32, #tpu.memory_space<vmem>>, vector<32x32xf32>
    tpu.vector_store %arg8[%c0_33, %c0_34], %42 {strides = array<i32>} : memref<32x32xf32, #tpu.memory_space<vmem>>, vector<32x32xf32>,
    return
  }
  func.func @transform_0(%arg0: i32) -> (i32, i32) {
    %c0_i32 = arith.constant 0 : i32
    %c0_i32_0 = arith.constant 0 : i32
    return %arg0, %c0_i32 : i32, i32
  }
  func.func @transform_1(%arg0: i32) -> (i32, i32, i32) {
    %c0_i32 = arith.constant 0 : i32
    %c0_i32_0 = arith.constant 0 : i32
    %c0_i32_1 = arith.constant 0 : i32
    %c0_i32_2 = arith.constant 0 : i32
    return %c0_i32, %c0_i32_0, %c0_i32_1 : i32, i32, i32
  }
  func.func @transform_2(%arg0: i32) -> (i32, i32) {
    %c0_i32 = arith.constant 0 : i32
    %c0_i32_0 = arith.constant 0 : i32
    %c0_i32_1 = arith.constant 0 : i32
    return %c0_i32, %c0_i32_0 : i32, i32
  }
  func.func @transform_3(%arg0: i32) -> (i32, i32, i32) {
    %c0_i32 = arith.constant 0 : i32
    %c0_i32_0 = arith.constant 0 : i32
    %c0_i32_1 = arith.constant 0 : i32
    %c0_i32_2 = arith.constant 0 : i32
    return %c0_i32, %c0_i32_0, %c0_i32_1 : i32, i32, i32
  }
  func.func @transform_4(%arg0: i32) -> (i32, i32) {
    %c0_i32 = arith.constant 0 : i32
    %c0_i32_0 = arith.constant 0 : i32
    %c0_i32_1 = arith.constant 0 : i32
    return %c0_i32, %c0_i32_0 : i32, i32
  }
  func.func @transform_5(%arg0: i32) -> (i32, i32) {
    %c0_i32 = arith.constant 0 : i32
    %c0_i32_0 = arith.constant 0 : i32
    %c0_i32_1 = arith.constant 0 : i32
    return %c0_i32, %c0_i32_0 : i32, i32
  }
  func.func @transform_6(%arg0: i32) -> (i32, i32) {
    %c0_i32 = arith.constant 0 : i32
    %c0_i32_0 = arith.constant 0 : i32
    %c0_i32_1 = arith.constant 0 : i32
    return %c0_i32, %c0_i32_0 : i32, i32
  }
  func.func @transform_7(%arg0: i32) -> (i32, i32) {
    %c0_i32 = arith.constant 0 : i32
    %c0_i32_0 = arith.constant 0 : i32
    return %arg0, %c0_i32 : i32, i32
  }
}

</mosaic_0001>

<bundles_post_ra>
// kernel: tile.8
= control target key start
LH: loop header
LB: loop body
LE: loop exit
PB: predicated region body
PF: predicated region fallthrough
CT: control target
= control target key end

     0   :  { %s40_s0 = inlined_call_operand.vmem [shape: f32[32], index: 0, kind: input, shape index: {}]   ;;  %s41_s1 = inlined_call_operand.vmem [shape: f32[32,32], index: 1, kind: output, shape index: {}]  }
   0x1   :  { %v4_v0 = vld [vmem:[%s40_s0] ss:$0 sm:$0xff] }
   0x2   :  { %5 = vst [vmem:[%s41_s1] sm:$0xff] %v4_v0 }
   0x3   :  { %12 = vst [vmem:[%s41_s1 + $0x8] sm:$0xff] %v4_v0 }
   0x4   :  { %13 = vst [vmem:[%s41_s1 + $0x10] sm:$0xff] %v4_v0 }
   0x5   :  { %14 = vst [vmem:[%s41_s1 + $0x18] sm:$0xff] %v4_v0 }

// kernel: tile.9
= control target key start
LH: loop header
LB: loop body
LE: loop exit
PB: predicated region body
PF: predicated region fallthrough
CT: control target
= control target key end

     0   :  { %s88_s8 = smov 96   ;;  %s89_s11 = smov 32   ;;  %vm3_vm0 = vcmask 261120   ;;  %vm10_vm1 = vcmask 1048320   ;;  %vm17_vm2 = vcmask 785920   ;;  %vm24_vm3 = vcmask 523520   ;;  %s137_s0 = inlined_call_operand.vmem [shape: f32[32,32], index: 0, kind: input, shape index: {}]   ;;  %s138_s1 = inlined_call_operand.vmem [shape: f32[1,1024], index: 1, kind: output, shape index: {}]  }
   0x1   :  { %v75_v0 = vld [vmem:[%s137_s0 + $0x3] ss:$4 sm:$0xff]   ;;  %v77_v1 = vld [vmem:[%s137_s0 + $0x1] ss:$4 sm:$0xff]   ;;  %v76_v2 = vld [vmem:[%s137_s0 + $0x2] ss:$4 sm:$0xff]  }
   0x2   :  { %8 = vrot.lane.b32.xlu0 %v75_v0, %s88_s8  ;;  %22 = vrot.lane.b32.xlu1 %v77_v1, %s89_s11  ;;  %s90_s14 = smov 64   ;;  %v2_v3 = vld [vmem:[%s137_s0] ss:$4 sm:$0xff]  }
   0x3   :  { %4 = vst.msk [vmem:[#allocation0] ss:$8 sm:$0xf] %vm3_vm0, %v2_v3  }
   0x4   :  { %5 = vst.msk [vmem:[#allocation0] ss:$8 sm:$0xf0] %vm3_vm0, %v2_v3  }
   0xa   :  { %15 = vrot.lane.b32.xlu0 %v76_v2, %s90_s14 }
  0x74   :  { %v9_v4 = vpop.permute.xlu0 %8   ;;  %v23_v5 = vpop.permute.xlu1 %22  }
  0x75   :  { %11 = vst.msk [vmem:[#allocation0] ss:$8 sm:$0xf] %vm10_vm1, %v9_v4  }
  0x76   :  { %12 = vst.msk [vmem:[#allocation0] ss:$8 sm:$0xf0] %vm10_vm1, %v9_v4  }
  0x7c   :  { %v16_v6 = vpop.permute.xlu0 %15  }
  0x7d   :  { %18 = vst.msk [vmem:[#allocation0] ss:$8 sm:$0xf] %vm17_vm2, %v16_v6  }
  0x7e   :  { %19 = vst.msk [vmem:[#allocation0] ss:$8 sm:$0xf0] %vm17_vm2, %v16_v6  }
  0x7f   :  { %25 = vst.msk [vmem:[#allocation0] ss:$8 sm:$0xf] %vm24_vm3, %v23_v5  }
  0x80   :  { %26 = vst.msk [vmem:[#allocation0] ss:$8 sm:$0xf0] %vm24_vm3, %v23_v5  }
  0x86   :  { %v29_v7 = vld [vmem:[#allocation0] sm:$0x1]  ;;  %v34_v8 = vld [vmem:[#allocation0 + $0x8] sm:$0x1]  ;;  %v40_v9 = vld [vmem:[#allocation0 + $0x10] sm:$0x1] }
  0x87   :  { %32 = vst [vmem:[%s138_s1] sm:$0x1] %v29_v7  ;;  %v46_v10 = vld [vmem:[#allocation0 + $0x18] sm:$0x1]  ;;  %v52_v11 = vld [vmem:[#allocation0 + $0x20] sm:$0x1] }
  0x88   :  { %78 = vst [vmem:[%s138_s1 + $0x1] sm:$0x1] %v34_v8  ;;  %v58_v12 = vld [vmem:[#allocation0 + $0x28] sm:$0x1]  ;;  %v64_v13 = vld [vmem:[#allocation0 + $0x30] sm:$0x1] }
  0x89   :  { %79 = vst [vmem:[%s138_s1 + $0x2] sm:$0x1] %v40_v9  ;;  %v70_v14 = vld [vmem:[#allocation0 + $0x38] sm:$0x1] }
  0x8a   :  { %80 = vst [vmem:[%s138_s1 + $0x3] sm:$0x1] %v46_v10 }
  0x8b   :  { %81 = vst [vmem:[%s138_s1 + $0x4] sm:$0x1] %v52_v11 }
  0x8c   :  { %82 = vst [vmem:[%s138_s1 + $0x5] sm:$0x1] %v58_v12 }
  0x8d   :  { %83 = vst [vmem:[%s138_s1 + $0x6] sm:$0x1] %v64_v13 }
  0x8e   :  { %84 = vst [vmem:[%s138_s1 + $0x7] sm:$0x1] %v70_v14 }

// kernel: upsampling_layer_forward.1
= control target key start
LH: loop header
LB: loop body
LE: loop exit
PB: predicated region body
PF: predicated region fallthrough
CT: control target
= control target key end

     0   :  { %s2982_s0 = inlined_call_operand.vmem [shape: f32[32,16], index: 0, kind: input, shape index: {}]   ;;  %s2983_s1 = inlined_call_operand.vmem [shape: bf16[3,32,16], index: 1, kind: input, shape index: {}]   ;;  %s2984_s2 = inlined_call_operand.vmem [shape: bf16[48,1024], index: 2, kind: input, shape index: {}]   ;;  %s2985_s3 = inlined_call_operand.vmem [shape: bf16[3,32,32], index: 3, kind: input, shape index: {}]   ;;  %s2986_s4 = inlined_call_operand.vmem [shape: bf16[1024,96], index: 4, kind: input, shape index: {}]   ;;  %s2987_s5 = inlined_call_operand.vmem [shape: f32[1,1024], index: 5, kind: input, shape index: {}]   ;;  %s2988_s6 = inlined_call_operand.<no memory space> [shape: f32[1,1], index: 6, kind: input, shape index: {}]   ;;  %s2989_s7 = inlined_call_operand.hbm [shape: f32[64,32], index: 7, kind: output, shape index: {}]  }
   0x1   :  { %12 = sst [smem:[#allocation2]] %s2988_s6 }
   0x2   :  { %13 = vsyncpa [#allocation4], 0 }
   0x3   :  { %15 = vsyncpa [#allocation4 + $0x1], 0  ;;  %s2445_s26 = smov 0   ;;  %s2447_s27 = smov 0  }
   0x4   :  { %s2449_s28 = smov 0   ;;  %s2451_s29 = smov 0  }
   0x5 LB: > { %s2466_s6 = sadd.s32 4294967295, %s2394_s29   ;;  %s1708_s30 = sadd.s32 4294967294, %s2394_s29   ;;  %s2394_s29 = sphi %s2451_s29, %s2995_s29   ;;  %s2390_s28 = sphi %s2449_s28, %s2994_s28   ;;  %s2386_s27 = sphi %s2447_s27, %s2993_s27   ;;  %s2382_s26 = sphi %s2445_s26, %s2992_s26  }
   0x6   : > { %s2470_s8 = sadd.s32 1, %s2394_s29   ;;  %s180_s9 = sadd.s32 1, %s2390_s28 }
   0x7   : > { %s177_s10 = ssub.s32 %s2394_s29, %s2470_s8  ;;  %p190_p0 = scmp.ne.s32.totalorder %s2390_s28, %s2386_s27 }
   0x8   : > { %p178_p1 = scmp.eq.s32.totalorder %s177_s10, 0  ;;  %p191_p2 = scmp.eq.s32.totalorder %s2466_s6, 1 }
   0x9   : > { %p196_p3 = scmp.ne.s32.totalorder %s2386_s27, %s2382_s26  ;;  %p197_p4 = scmp.eq.s32.totalorder %s1708_s30, 1 }
   0xa   : > { %s2481_s11 = scalar_select %p178_p1, %s2390_s28, %s180_s9  }
   0xb   : > { %p2483_p5 = por %p191_p2, %p190_p0  ;;  %p2487_p6 = por %p197_p4, %p196_p3 }
   0xc   : > { %p1711_p7 = scmp.ge.s32.totalorder %s2394_s29, 1  ;;  %p242_p8 = scmp.lt.s32.totalorder %s2394_s29, 3 }
   0xe   : > { %p243_p9 = pnand %p1711_p7, %p242_p8 }
   0xf   : > { %s1713_s14 = sshll.u32 (!%p243_p9), %s2466_s6, 1  ;;  %s2396_s16 = smov (!%p243_p9), 16  }
  0x10   : > { %246 = sbr.rel (%p243_p9) target bundleno = 932 (0x3a4), region = 48  ;;  %p275_p10 = scmp.lt.s32.totalorder (!%p243_p9), %s1713_s14, 3 }
  0x11   : > { %s2397_s17 = smov (!%p243_p9), 32   ;;  %s2398_s19 = smov (!%p243_p9), 64  }
  0x12   : > { %s2399_s20 = smov (!%p243_p9), 96   ;;  %s2264_s22 = sshll.u32 (!%p243_p9), %s2466_s6, 5 }
  0x13   : > { %s1642_s25 = scalar_lea.hbm (!%p243_p9), %s2989_s7, %s2264_s22 }
  0x14   : > { %s1645_s9 = sshll.u32 (!%p243_p9), %s1642_s25, 4  ;;  %s1646_s9 = int_to_ptr.hbm [resolvable:$true] %s1645_s9 }
  0x15   : > { %s2997_s14 = smov (!%p275_p10, %s1713_s14), 3  ;;  %v2165_v3 = vld [vmem:[%s2983_s1 + $0x8] sm:$0xff]  ;;  %v2167_v4 = vld [vmem:[%s2983_s1 + $0x18] sm:$0xff]  ;;  %vm299_vm0 = vcmask 130048   ;;  %v2166_v5 = vld [vmem:[%s2983_s1 + $0x10] sm:$0xff]  ;;  %vm441_vm1 = vcmask 261120  }
  0x16   : > { %s1714_s15 = sshll.u32 %s2997_s14, 3  ;;  %v2164_v6 = vld [vmem:[%s2983_s1] sm:$0xff]  ;;  %v2169_v8 = vld [vmem:[%s2983_s1 + $0x28] sm:$0xff]  ;;  %v1835_v60 = vld [vmem:[%s2984_s2 + $0x90] sm:$0xf]  ;;  %vm610_vm2 = vcmask 392192  }
  0x17   : > { %s278_s18 = scalar_lea.vmem %s2982_s0, %s1714_s15  ;;  %v2168_v7 = vld [vmem:[%s2983_s1 + $0x20] sm:$0xff]  ;;  %v1827_v28 = vld [vmem:[%s2984_s2 + $0x88] sm:$0xf]  ;;  %v2187_v32 = vld [vmem:[%s2984_s2 + $0x8c] sm:$0xf]  ;;  %s2346_s10 = sshra.s32 %s1646_s9, 4  ;;  %s2347_s10 = int_to_ptr.hbm [resolvable:$true] %s2346_s10 }
  0x18   : > { %v282_v0 = vld [vmem:[%s278_s18] sm:$0xff]  ;;  %v283_v1 = vld [vmem:[%s278_s18 + $0x8] sm:$0xff]  ;;  %v2192_v61 = vld [vmem:[%s2984_s2 + $0xac] sm:$0xf0]  ;;  %s1620_s18 = sld [smem:[#allocation2]]  ;;  %s2348_s14 = scalar_lea.hbm %s2347_s10, 32 }
  0x19   : > { %v284_v2 = vpack.c.bf16 %v283_v1, %v282_v0  ;;  %v1819_v23 = vld [vmem:[%s2984_s2 + $0x80] sm:$0xf]  ;;  %v2186_v25 = vld [vmem:[%s2984_s2 + $0x84] sm:$0xf]  ;;  %v2191_v29 = vld [vmem:[%s2984_s2 + $0xa4] sm:$0xf0]  ;;  %v1836_v0 = vor.u32 %v2192_v61, %v1835_v60  ;;  %p2349_p11 = scmp.ne.s32.totalorder %s2347_s10, %s2348_s14  ;;  %p2353_p0 = scmp.lt.s32.totalorder %s2347_s10, %s2989_s7 }
  0x1a   : > { %v2190_v24 = vld [vmem:[%s2984_s2 + $0x9c] sm:$0xf0]  ;;  %v1821_v27 = vld [vmem:[%s2984_s2 + $0xa0] sm:$0xf0]  ;;  %v1828_v31 = vor.u32 %v2191_v29, %v1827_v28  ;;  %v1829_v33 = vld [vmem:[%s2984_s2 + $0xa8] sm:$0xf0] }
  0x1b   : > { %2265 = vmatpush.bf16.msra.mxu2 %v284_v2  ;;  %2266 = vmatpush.bf16.msra.mxu3 %v284_v2  ;;  %v1820_v26 = vor.u32 %v2190_v24, %v1819_v23  ;;  %v1824_v30 = vor.u32 %v2186_v25, %v1821_v27  ;;  %v1787_v34 = vld [vmem:[%s2984_s2 + $0x40] sm:$0xf]  ;;  %v1832_v35 = vor.u32 %v2187_v32, %v1829_v33  ;;  %v2178_v37 = vld [vmem:[%s2984_s2 + $0x44] sm:$0xf]  ;;  %v1795_v41 = vld [vmem:[%s2984_s2 + $0x48] sm:$0xf]  ;;  %p2350_p12 = pnand %p2349_p11, %p2483_p5 }
  0x1c   : > { %353 = vmatpush.bf16.msra.mxu1 %v284_v2  ;;  %313 = vmatpush.bf16.msra.mxu0 %v284_v2  ;;  %v2182_v36 = vld [vmem:[%s2984_s2 + $0x5c] sm:$0xf0]  ;;  %v1789_v38 = vld [vmem:[%s2984_s2 + $0x60] sm:$0xf0]  ;;  %v2183_v42 = vld [vmem:[%s2984_s2 + $0x64] sm:$0xf0] }
  0x1d   : > { %v1788_v39 = vor.u32 %v2182_v36, %v1787_v34  ;;  %v1792_v40 = vor.u32 %v2178_v37, %v1789_v38  ;;  %v2179_v43 = vld [vmem:[%s2984_s2 + $0x4c] sm:$0xf]  ;;  %v1796_v44 = vor.u32 %v2183_v42, %v1795_v41  ;;  %v1755_v47 = vld [vmem:[%s2984_s2] sm:$0xf]  ;;  %v2170_v49 = vld [vmem:[%s2984_s2 + $0x4] sm:$0xf]  ;;  %p2351_p13 = pneg %p2350_p12 }
  0x1e   : > { %1724 = vmatmul.msk.bf16.vlgmr.msra.gmra.mxu2 %vm299_vm0, %v2165_v3  ;;  %1738 = vmatmul.msk.bf16.vlgmr.msra.gmra.mxu3 %vm299_vm0, %v2167_v4  ;;  %v1797_v45 = vld [vmem:[%s2984_s2 + $0x68] sm:$0xf0]  ;;  %v2174_v48 = vld [vmem:[%s2984_s2 + $0x1c] sm:$0xf0]  ;;  %v1757_v51 = vld [vmem:[%s2984_s2 + $0x20] sm:$0xf0] }
  0x1f   : > { %393 = vmatpush.bf16.msrb.mxu2 %v284_v2  ;;  %1737 = vmatmul.msk.bf16.vlgmr.msra.gmra.mxu1 %vm299_vm0, %v2166_v5  ;;  %v1800_v46 = vor.u32 %v2179_v43, %v1797_v45  ;;  %v1756_v50 = vor.u32 %v2174_v48, %v1755_v47  ;;  %v1763_v52 = vld [vmem:[%s2984_s2 + $0x8] sm:$0xf]  ;;  %v1760_v54 = vor.u32 %v2170_v49, %v1757_v51  ;;  %v2171_v56 = vld [vmem:[%s2984_s2 + $0xc] sm:$0xf]  ;;  %v2188_v62 = vld [vmem:[%s2984_s2 + $0x94] sm:$0xf] }
  0x20   : > { %1723 = vmatmul.msk.bf16.vlgmr.msra.gmra.mxu0 %vm299_vm0, %v2164_v6  ;;  %622 = vmatpush.bf16.msrb.mxu3 %v1820_v26  ;;  %v2175_v53 = vld [vmem:[%s2984_s2 + $0x24] sm:$0xf0]  ;;  %v1765_v57 = vld [vmem:[%s2984_s2 + $0x28] sm:$0xf0]  ;;  %v1837_v1 = vld [vmem:[%s2984_s2 + $0xb0] sm:$0xf0] }
  0x21   : > { %641 = vmatpush.bf16.msrb.mxu0 %v1824_v30  ;;  %660 = vmatpush.bf16.msrb.mxu1 %v1828_v31  ;;  %v1764_v55 = vor.u32 %v2175_v53, %v1763_v52  ;;  %v1768_v58 = vor.u32 %v2171_v56, %v1765_v57  ;;  %v1843_v2 = vld [vmem:[%s2984_s2 + $0x98] sm:$0xf]  ;;  %v1840_v4 = vor.u32 %v2188_v62, %v1837_v1  ;;  %v2189_v6 = vld [vmem:[%s2984_s2 + $0x9c] sm:$0xf]  ;;  %v2176_v23 = vld [vmem:[%s2984_s2 + $0x2c] sm:$0xf0] }
  0x22   : > { %v2193_v3 = vld [vmem:[%s2984_s2 + $0xb4] sm:$0xf0]  ;;  %v2172_v25 = vld [vmem:[%s2984_s2 + $0x14] sm:$0xf]  ;;  %v2173_v32 = vld [vmem:[%s2984_s2 + $0x1c] sm:$0xf] }
  0x23   : > { %679 = vmatpush.bf16.msra.mxu2 %v1832_v35  ;;  %v1844_v5 = vor.u32 %v2193_v3, %v1843_v2  ;;  %v1773_v26 = vld [vmem:[%s2984_s2 + $0x30] sm:$0xf0]  ;;  %v1779_v27 = vld [vmem:[%s2984_s2 + $0x18] sm:$0xf]  ;;  %v1781_v33 = vld [vmem:[%s2984_s2 + $0x38] sm:$0xf0] }
  0x24   : > { %623 = vmatpush.bf16.msrb.mxu3 %v1788_v39  ;;  %v2177_v31 = vld [vmem:[%s2984_s2 + $0x34] sm:$0xf0]  ;;  %v1776_v35 = vor.u32 %v2172_v25, %v1773_v26  ;;  %v1784_v38 = vor.u32 %v2173_v32, %v1781_v33  ;;  %v2216_v60 = vld [vmem:[%s2986_s4 + $0xb0] sm:$0xff]  ;;  %v2199_v1 = vld [vmem:[%s2986_s4 + $0x28] sm:$0xff] }
  0x25   : > { %642 = vmatpush.bf16.msrb.mxu0 %v1792_v40  ;;  %661 = vmatpush.bf16.msrb.mxu1 %v1796_v44  ;;  %v1780_v36 = vor.u32 %v2177_v31, %v1779_v27  ;;  %v2201_v57 = vld [vmem:[%s2986_s4 + $0x38] sm:$0xff]  ;;  %v2200_v61 = vld [vmem:[%s2986_s4 + $0x30] sm:$0xff]  ;;  %v2223_v2 = vld [vmem:[%s2986_s4 + $0xe8] sm:$0xff] }
  0x26   : > { %v2224_v62 = vld [vmem:[%s2986_s4 + $0xf0] sm:$0xff]  ;;  %v2206_v3 = vld [vmem:[%s2986_s4 + $0x60] sm:$0xff]  ;;  %v2239_v31 = vld [vmem:[%s2986_s4 + $0x168] sm:$0xff] }
  0x27   : > { %680 = vmatpush.bf16.msra.mxu2 %v1800_v46  ;;  %v2194_v25 = vld [vmem:[%s2986_s4] sm:$0xff]  ;;  %v2240_v27 = vld [vmem:[%s2986_s4 + $0x170] sm:$0xff]  ;;  %v2247_v32 = vld [vmem:[%s2986_s4 + $0x1a8] sm:$0xff] }
  0x28   : > { %624 = vmatpush.bf16.msrb.mxu3 %v1756_v50  ;;  %v2218_v26 = vld [vmem:[%s2986_s4 + $0xc0] sm:$0xff]  ;;  %v2232_v33 = vld [vmem:[%s2986_s4 + $0x130] sm:$0xff] }
  0x29   : > { %643 = vmatpush.bf16.msrb.mxu0 %v1760_v54  ;;  %662 = vmatpush.bf16.msrb.mxu1 %v1764_v55 }
  0x2b   : > { %681 = vmatpush.bf16.msra.mxu2 %v1768_v58  ;;  %v2225_v58 = vld [vmem:[%s2986_s4 + $0xf8] sm:$0xff] }
  0x2c   : > { %698 = vmatpush.bf16.msra.mxu3 %v1836_v0  ;;  %v2215_v0 = vld [vmem:[%s2986_s4 + $0xa8] sm:$0xff] }
  0x2d   : > { %717 = vmatpush.bf16.msra.mxu0 %v1840_v4  ;;  %736 = vmatpush.bf16.msra.mxu1 %v1844_v5  ;;  %v2214_v4 = vld [vmem:[%s2986_s4 + $0xa0] sm:$0xff]  ;;  %v2205_v5 = vld [vmem:[%s2986_s4 + $0x58] sm:$0xff] }
  0x2e   : > { %1751 = vmatmul.msk.bf16.vlgmr.msrb.gmra.mxu2 %vm299_vm0, %v2168_v7  ;;  %v1845_v7 = vld [vmem:[%s2984_s2 + $0xb8] sm:$0xf0] }
  0x3e   : > { %1752 = vmatmul.msk.bf16.gmra.mxu2 %vm299_vm0, %v2169_v8  ;;  %v1803_v8 = vld [vmem:[%s2984_s2 + $0x50] sm:$0xf] }
  0x9c   : > { %v355_v9 = vpop.f32.mrf.mxu1 }
  0x9d   : > { %v315_v59 = vpop.f32.mrf.mxu0 }
  0xa1   : > { %v2521_v10 = vpop.f32.mrf.mxu2  ;;  %v360_v11 = vpop.f32.mrf.mxu3 }
  0xa4   : > { %v357_v12 = vpop.f32.mrf.mxu1 }
  0xa5   : > { %v2312_v13 = vpack.i.bf16 %v357_v12, %v355_v9  ;;  %v1848_v9 = vor.u32 %v2189_v6, %v1845_v7  ;;  %v2180_v12 = vld [vmem:[%s2984_s2 + $0x54] sm:$0xf]  ;;  %v317_v34 = vpop.f32.mrf.mxu0  ;;  %v2213_v6 = vld [vmem:[%s2986_s4 + $0x98] sm:$0xff]  ;;  %v2198_v7 = vld [vmem:[%s2986_s4 + $0x20] sm:$0xff] }
  0xa7   : > { %2313 = vrot.lane.b32.xlu0 %v2312_v13, %s2396_s16  ;;  %v1805_v13 = vld [vmem:[%s2984_s2 + $0x70] sm:$0xf0]  ;;  %755 = vmatpush.bf16.msrb.mxu2 %v1848_v9 }
  0xa8   : > { %v2204_v9 = vld [vmem:[%s2986_s4 + $0x50] sm:$0xff] }
  0xa9   : > { %v2523_v14 = vpop.f32.mrf.mxu2  ;;  %v362_v15 = vpop.f32.mrf.mxu3 }
  0xaa   : > { %v2322_v16 = vpack.i.bf16 %v362_v15, %v360_v11  ;;  %v2184_v11 = vld [vmem:[%s2984_s2 + $0x6c] sm:$0xf0] }
  0xab   : > { %v1804_v15 = vor.u32 %v2184_v11, %v1803_v8  ;;  %v2222_v8 = vld [vmem:[%s2986_s4 + $0xe0] sm:$0xff]  ;;  %v2212_v11 = vld [vmem:[%s2986_s4 + $0x90] sm:$0xff] }
  0xac   : > { %2323 = vrot.lane.b32.xlu1 %v2322_v16, %s2396_s16  ;;  %v1808_v16 = vor.u32 %v2180_v12, %v1805_v13  ;;  %v2197_v12 = vld [vmem:[%s2986_s4 + $0x18] sm:$0xff] }
  0xad   : > { %699 = vmatpush.bf16.msra.mxu3 %v1804_v15  ;;  %v2221_v13 = vld [vmem:[%s2986_s4 + $0xd8] sm:$0xff]  ;;  %v2203_v15 = vld [vmem:[%s2986_s4 + $0x48] sm:$0xff] }
  0xae   : > { %718 = vmatpush.bf16.msra.mxu0 %v1808_v16  ;;  %v2211_v16 = vld [vmem:[%s2986_s4 + $0x88] sm:$0xff] }
  0xb1   : > { %v395_v17 = vpop.f32.mrf.mxu2 }
  0xb2   : > { %719 = vmatpush.bf16.msra.mxu0 %v1776_v35  ;;  %v2238_v35 = vld [vmem:[%s2986_s4 + $0x160] sm:$0xff] }
  0xb9   : > { %v397_v18 = vpop.f32.mrf.mxu2 }
  0xba   : > { %v2317_v19 = vpack.i.bf16 %v397_v18, %v395_v17  ;;  %v1811_v17 = vld [vmem:[%s2984_s2 + $0x58] sm:$0xf] }
  0xbb   : > { %v2185_v18 = vld [vmem:[%s2984_s2 + $0x74] sm:$0xf0] }
  0xbc   : > { %2318 = vrot.lane.b32.xlu0 %v2317_v19, %s2397_s17  ;;  %v2181_v19 = vld [vmem:[%s2984_s2 + $0x5c] sm:$0xf] }
  0xc1   : > { %v400_v20 = vpop.f32.mrf.mxu2 }
  0xc9   : > { %v402_v21 = vpop.f32.mrf.mxu2 }
  0xca   : > { %v2327_v22 = vpack.i.bf16 %v402_v21, %v400_v20  ;;  %v1812_v20 = vor.u32 %v2185_v18, %v1811_v17  ;;  %v1813_v21 = vld [vmem:[%s2984_s2 + $0x78] sm:$0xf0]  ;;  %v2196_v17 = vld [vmem:[%s2986_s4 + $0x10] sm:$0xff] }
  0xcb   : > { %v1816_v24 = vor.u32 %v2181_v19, %v1813_v21  ;;  %v2220_v18 = vld [vmem:[%s2986_s4 + $0xd0] sm:$0xff]  ;;  %v2202_v19 = vld [vmem:[%s2986_s4 + $0x40] sm:$0xff]  ;;  %v2195_v21 = vld [vmem:[%s2986_s4 + $0x8] sm:$0xff] }
  0xcc   : > { %2328 = vrot.lane.b32.xlu1 %v2327_v22, %s2397_s17  ;;  %v1771_v22 = vld [vmem:[%s2984_s2 + $0x10] sm:$0xf]  ;;  %737 = vmatpush.bf16.msra.mxu1 %v1812_v20  ;;  %v2210_v20 = vld [vmem:[%s2986_s4 + $0x80] sm:$0xff]  ;;  %s2352_s17 = scalar_lea.hbm %s2989_s7, 64 }
  0xcd   : > { %v1772_v30 = vor.u32 %v2176_v23, %v1771_v22  ;;  %756 = vmatpush.bf16.msrb.mxu2 %v1816_v24  ;;  %v2219_v22 = vld [vmem:[%s2986_s4 + $0xc8] sm:$0xff]  ;;  %v2241_v23 = vld [vmem:[%s2986_s4 + $0x178] sm:$0xff]  ;;  %p2354_p1 = scmp.lt.s32.totalorder %s2352_s17, %s2348_s14 }
  0xce   : > { %v2249_v24 = vld [vmem:[%s2986_s4 + $0x1b8] sm:$0xff] }
  0xcf   : > { %700 = vmatpush.bf16.msra.mxu3 %v1772_v30  ;;  %v2257_v30 = vld [vmem:[%s2986_s4 + $0x1f8] sm:$0xff]  ;;  %p2355_p2 = por %p2354_p1, %p2353_p0 }
  0xd0   : > { %738 = vmatpush.bf16.msra.mxu1 %v1780_v36  ;;  %v2246_v36 = vld [vmem:[%s2986_s4 + $0x1a0] sm:$0xff] }
  0xd1   : > { %757 = vmatpush.bf16.msrb.mxu2 %v1784_v38  ;;  %v2255_v38 = vld [vmem:[%s2986_s4 + $0x1e8] sm:$0xff]  ;;  %p2356_p3 = pnand %p2355_p2, %p2351_p13 }
 0x119   : > { %v2314_v63 = vpop.permute.xlu0 %2313 }
 0x11a   : > { %v2316_v28 = vunpack.i.h.bf16 %v2314_v63  ;;  %v2315_v29 = vunpack.i.l.bf16 %v2314_v63  ;;  %v2207_v63 = vld [vmem:[%s2986_s4 + $0x68] sm:$0xff] }
 0x11c   : > { %v437_v41 = vsel %vm299_vm0, %v315_v59, %v2315_v29  ;;  %v438_v42 = vsel %vm299_vm0, %v317_v34, %v2316_v28  ;;  %v2208_v59 = vld [vmem:[%s2986_s4 + $0x70] sm:$0xff]  ;;  %v2233_v29 = vld [vmem:[%s2986_s4 + $0x138] sm:$0xff] }
 0x11d   : > { %v2248_v28 = vld [vmem:[%s2986_s4 + $0x1b0] sm:$0xff] }
 0x11e   : > { %v2324_v46 = vpop.permute.xlu1 %2323  ;;  %v2256_v34 = vld [vmem:[%s2986_s4 + $0x1f0] sm:$0xff] }
 0x11f   : > { %v2326_v47 = vunpack.i.h.bf16 %v2324_v46  ;;  %v2325_v48 = vunpack.i.l.bf16 %v2324_v46 }
 0x121   : > { %v439_v52 = vsel %vm299_vm0, %v2521_v10, %v2325_v48  ;;  %v440_v53 = vsel %vm299_vm0, %v2523_v14, %v2326_v47  ;;  %v2209_v10 = vld [vmem:[%s2986_s4 + $0x78] sm:$0xff]  ;;  %v2236_v47 = vld [vmem:[%s2986_s4 + $0x150] sm:$0xff] }
 0x122   : > { %v2217_v14 = vld [vmem:[%s2986_s4 + $0xb8] sm:$0xff]  ;;  %v2244_v48 = vld [vmem:[%s2986_s4 + $0x190] sm:$0xff] }
 0x12e   : > { %v2319_v37 = vpop.permute.xlu0 %2318 }
 0x12f   : > { %v2321_v39 = vunpack.i.h.bf16 %v2319_v37  ;;  %v2320_v40 = vunpack.i.l.bf16 %v2319_v37  ;;  %v2231_v37 = vld [vmem:[%s2986_s4 + $0x128] sm:$0xff] }
 0x131   : > { %v442_v43 = vsel %vm441_vm1, %v437_v41, %v2320_v40  ;;  %v443_v44 = vsel %vm441_vm1, %v438_v42, %v2321_v39  ;;  %v2237_v39 = vld [vmem:[%s2986_s4 + $0x158] sm:$0xff]  ;;  %v2842_v41 = vld [vmem:[%s2987_s5] sm:$0xff] }
 0x132   : > { %v446_v45 = vpack.c.bf16 %v443_v44, %v442_v43  ;;  %v2245_v40 = vld [vmem:[%s2986_s4 + $0x198] sm:$0xff]  ;;  %v2230_v44 = vld [vmem:[%s2986_s4 + $0x120] sm:$0xff]  ;;  %v2851_v46 = vperm.slane %v2842_v41, 1 }
 0x134   : > { %1849 = vmatmul.msk.bf16.vlgmr.msrb.gmra.mxu3 %vm610_vm2, %v446_v45  ;;  %1851 = vmatmul.msk.bf16.vlgmr.msrb.gmra.mxu0 %vm610_vm2, %v446_v45 }
 0x135   : > { %1853 = vmatmul.msk.bf16.vlgmr.msrb.gmra.mxu1 %vm610_vm2, %v446_v45  ;;  %1855 = vmatmul.msk.bf16.vlgmr.msra.gmra.mxu2 %vm610_vm2, %v446_v45 }
 0x136   : > { %1348 = vmatpush.bf16.msrb.mxu0 %v2209_v10  ;;  %1367 = vmatpush.bf16.msrb.mxu1 %v2217_v14 }
 0x137   : > { %1329 = vmatpush.bf16.msrb.mxu3 %v2201_v57  ;;  %1386 = vmatpush.bf16.msra.mxu2 %v2225_v58  ;;  %v2877_v57 = vperm.slane %v2842_v41, 0 }
 0x13a   : > { %1349 = vmatpush.bf16.msrb.mxu0 %v2208_v59  ;;  %1368 = vmatpush.bf16.msrb.mxu1 %v2216_v60  ;;  %v2228_v60 = vld [vmem:[%s2986_s4 + $0x110] sm:$0xff] }
 0x13b   : > { %1330 = vmatpush.bf16.msrb.mxu3 %v2200_v61  ;;  %1387 = vmatpush.bf16.msra.mxu2 %v2224_v62  ;;  %v2252_v61 = vld [vmem:[%s2986_s4 + $0x1d0] sm:$0xff]  ;;  %v477_v62 = vperm.slane %v2842_v41, 3 }
 0x13e   : > { %v2329_v49 = vpop.permute.xlu1 %2328  ;;  %1350 = vmatpush.bf16.msrb.mxu0 %v2207_v63  ;;  %1369 = vmatpush.bf16.msrb.mxu1 %v2215_v0 }
 0x13f   : > { %v2331_v50 = vunpack.i.h.bf16 %v2329_v49  ;;  %v2330_v51 = vunpack.i.l.bf16 %v2329_v49  ;;  %1331 = vmatpush.bf16.msrb.mxu3 %v2199_v1  ;;  %1388 = vmatpush.bf16.msra.mxu2 %v2223_v2  ;;  %v2860_v49 = vperm.slane %v2842_v41, 2  ;;  %v2234_v2 = vld [vmem:[%s2986_s4 + $0x140] sm:$0xff] }
 0x141   : > { %v445_v54 = vsel %vm441_vm1, %v440_v53, %v2331_v50  ;;  %v444_v55 = vsel %vm441_vm1, %v439_v52, %v2330_v51  ;;  %v2229_v50 = vld [vmem:[%s2986_s4 + $0x118] sm:$0xff] }
 0x142   : > { %v447_v56 = vpack.c.bf16 %v445_v54, %v444_v55  ;;  %1351 = vmatpush.bf16.msrb.mxu0 %v2206_v3  ;;  %1370 = vmatpush.bf16.msrb.mxu1 %v2214_v4  ;;  %v2253_v51 = vld [vmem:[%s2986_s4 + $0x1d8] sm:$0xff]  ;;  %v2235_v55 = vld [vmem:[%s2986_s4 + $0x148] sm:$0xff]  ;;  %v2242_v3 = vld [vmem:[%s2986_s4 + $0x180] sm:$0xff] }
 0x143   : > { %1332 = vmatpush.bf16.msrb.mxu3 %v2198_v7  ;;  %1389 = vmatpush.bf16.msra.mxu2 %v2222_v8  ;;  %v2227_v8 = vld [vmem:[%s2986_s4 + $0x108] sm:$0xff] }
 0x144   : > { %1850 = vmatmul.msk.bf16.gmra.mxu3 %vm610_vm2, %v447_v56  ;;  %1852 = vmatmul.msk.bf16.gmra.mxu0 %vm610_vm2, %v447_v56 }
 0x145   : > { %1854 = vmatmul.msk.bf16.gmra.mxu1 %vm610_vm2, %v447_v56  ;;  %1856 = vmatmul.msk.bf16.gmra.mxu2 %vm610_vm2, %v447_v56 }
 0x146   : > { %1352 = vmatpush.bf16.msrb.mxu0 %v2205_v5  ;;  %1371 = vmatpush.bf16.msrb.mxu1 %v2213_v6 }
 0x147   : > { %1333 = vmatpush.bf16.msrb.mxu3 %v2197_v12  ;;  %1390 = vmatpush.bf16.msra.mxu2 %v2221_v13 }
 0x14a   : > { %1353 = vmatpush.bf16.msrb.mxu0 %v2204_v9  ;;  %1372 = vmatpush.bf16.msrb.mxu1 %v2212_v11  ;;  %v2251_v9 = vld [vmem:[%s2986_s4 + $0x1c8] sm:$0xff] }
 0x14b   : > { %1334 = vmatpush.bf16.msrb.mxu3 %v2196_v17  ;;  %1391 = vmatpush.bf16.msra.mxu2 %v2220_v18 }
 0x14e   : > { %1354 = vmatpush.bf16.msrb.mxu0 %v2203_v15  ;;  %1373 = vmatpush.bf16.msrb.mxu1 %v2211_v16 }
 0x14f   : > { %1335 = vmatpush.bf16.msrb.mxu3 %v2195_v21  ;;  %1392 = vmatpush.bf16.msra.mxu2 %v2219_v22  ;;  %v2226_v22 = vld [vmem:[%s2986_s4 + $0x100] sm:$0xff] }
 0x152   : > { %1355 = vmatpush.bf16.msrb.mxu0 %v2202_v19  ;;  %1374 = vmatpush.bf16.msrb.mxu1 %v2210_v20 }
 0x153   : > { %1336 = vmatpush.bf16.msrb.mxu3 %v2194_v25  ;;  %1393 = vmatpush.bf16.msra.mxu2 %v2218_v26 }
 0x154   : > { %1857 = vmatmul.msk.bf16.vlgmr.msra.gmra.mxu3 %vm610_vm2, %v446_v45  ;;  %1859 = vmatmul.msk.bf16.vlgmr.msra.gmra.mxu0 %vm610_vm2, %v446_v45 }
 0x155   : > { %1861 = vmatmul.msk.bf16.vlgmr.msra.gmra.mxu1 %vm610_vm2, %v446_v45  ;;  %1863 = vmatmul.msk.bf16.vlgmr.msrb.gmra.mxu2 %vm610_vm2, %v446_v45  ;;  %v2254_v45 = vld [vmem:[%s2986_s4 + $0x1e0] sm:$0xff] }
 0x156   : > { %1424 = vmatpush.bf16.msra.mxu0 %v2241_v23  ;;  %1443 = vmatpush.bf16.msra.mxu1 %v2249_v24  ;;  %v2250_v23 = vld [vmem:[%s2986_s4 + $0x1c0] sm:$0xff] }
 0x157   : > { %1405 = vmatpush.bf16.msra.mxu3 %v2233_v29  ;;  %1462 = vmatpush.bf16.msrb.mxu2 %v2257_v30 }
 0x15a   : > { %1425 = vmatpush.bf16.msra.mxu0 %v2240_v27  ;;  %1444 = vmatpush.bf16.msra.mxu1 %v2248_v28 }
 0x15b   : > { %1406 = vmatpush.bf16.msra.mxu3 %v2232_v33  ;;  %1463 = vmatpush.bf16.msrb.mxu2 %v2256_v34 }
 0x15e   : > { %1426 = vmatpush.bf16.msra.mxu0 %v2239_v31  ;;  %1445 = vmatpush.bf16.msra.mxu1 %v2247_v32 }
 0x15f   : > { %1407 = vmatpush.bf16.msra.mxu3 %v2231_v37  ;;  %1464 = vmatpush.bf16.msrb.mxu2 %v2255_v38 }
 0x162   : > { %1427 = vmatpush.bf16.msra.mxu0 %v2238_v35  ;;  %1446 = vmatpush.bf16.msra.mxu1 %v2246_v36 }
 0x163   : > { %1408 = vmatpush.bf16.msra.mxu3 %v2230_v44  ;;  %1465 = vmatpush.bf16.msrb.mxu2 %v2254_v45 }
 0x164   : > { %1858 = vmatmul.msk.bf16.gmra.mxu3 %vm610_vm2, %v447_v56  ;;  %1860 = vmatmul.msk.bf16.gmra.mxu0 %vm610_vm2, %v447_v56 }
 0x165   : > { %1862 = vmatmul.msk.bf16.gmra.mxu1 %vm610_vm2, %v447_v56  ;;  %1864 = vmatmul.msk.bf16.gmra.mxu2 %vm610_vm2, %v447_v56  ;;  %v2243_v56 = vld [vmem:[%s2986_s4 + $0x188] sm:$0xff] }
 0x166   : > { %1428 = vmatpush.bf16.msra.mxu0 %v2237_v39  ;;  %1447 = vmatpush.bf16.msra.mxu1 %v2245_v40 }
 0x167   : > { %1409 = vmatpush.bf16.msra.mxu3 %v2229_v50  ;;  %1466 = vmatpush.bf16.msrb.mxu2 %v2253_v51 }
 0x16a   : > { %1429 = vmatpush.bf16.msra.mxu0 %v2236_v47  ;;  %1448 = vmatpush.bf16.msra.mxu1 %v2244_v48 }
 0x16b   : > { %1410 = vmatpush.bf16.msra.mxu3 %v2228_v60  ;;  %1467 = vmatpush.bf16.msrb.mxu2 %v2252_v61 }
 0x16e   : > { %1430 = vmatpush.bf16.msra.mxu0 %v2235_v55  ;;  %1449 = vmatpush.bf16.msra.mxu1 %v2243_v56  ;;  %v479_v55 = vperm.slane %v2842_v41, 5 }
 0x16f   : > { %1411 = vmatpush.bf16.msra.mxu3 %v2227_v8  ;;  %1468 = vmatpush.bf16.msrb.mxu2 %v2251_v9 }
 0x172   : > { %1431 = vmatpush.bf16.msra.mxu0 %v2234_v2  ;;  %1450 = vmatpush.bf16.msra.mxu1 %v2242_v3 }
 0x173   : > { %1412 = vmatpush.bf16.msra.mxu3 %v2226_v22  ;;  %1469 = vmatpush.bf16.msrb.mxu2 %v2250_v23 }
 0x1b1   : > { %v645_v42 = vpop.f32.mrf.mxu0 }
 0x1b2   : > { %v664_v43 = vpop.f32.mrf.mxu1  ;;  %v646_v53 = vadd.f32 %v645_v42, %v2851_v46 }
 0x1b3   : > { %v665_v10 = vadd.f32 %v664_v43, %v2860_v49 }
 0x1b4   : > { %v770_v0 = vmax.f32 %v646_v53, 0.0 }
 0x1b5   : > { %v771_v4 = vmax.f32 %v665_v10, 0.0  ;;  %v480_v10 = vperm.slane %v2842_v41, 6 }
 0x1b7   : > { %v626_v52 = vpop.f32.mrf.mxu3 }
 0x1b8   : > { %v683_v54 = vpop.f32.mrf.mxu2  ;;  %v627_v6 = vadd.f32 %v626_v52, %v2877_v57 }
 0x1b9   : > { %v647_v14 = vpop.f32.mrf.mxu0  ;;  %v684_v11 = vadd.f32 %v683_v54, %v477_v62 }
 0x1ba   : > { %v648_v58 = vadd.f32 %v647_v14, %v2851_v46  ;;  %v666_v59 = vpop.f32.mrf.mxu1  ;;  %v769_v19 = vmax.f32 %v627_v6, 0.0 }
 0x1bb   : > { %v667_v63 = vadd.f32 %v666_v59, %v2860_v49  ;;  %v772_v24 = vmax.f32 %v684_v11, 0.0 }
 0x1bc   : > { %v778_v1 = vmax.f32 %v648_v58, 0.0 }
 0x1bd   : > { %v779_v5 = vmax.f32 %v667_v63, 0.0 }
 0x1be   : > { %v802_v7 = vpack.c.bf16 %v778_v1, %v770_v0  ;;  %v481_v1 = vperm.slane %v2842_v41, 7 }
 0x1bf   : > { %v803_v12 = vpack.c.bf16 %v779_v5, %v771_v4  ;;  %v628_v13 = vpop.f32.mrf.mxu3 }
 0x1c0   : > { %v629_v15 = vadd.f32 %v628_v13, %v2877_v57  ;;  %v685_v16 = vpop.f32.mrf.mxu2  ;;  %1356 = vmatmul.bf16.vlgmr.msrb.gmra.mxu0 %v802_v7 }
 0x1c1   : > { %v686_v17 = vadd.f32 %v685_v16, %v477_v62  ;;  %1375 = vmatmul.bf16.vlgmr.msrb.gmra.mxu1 %v803_v12  ;;  %v650_v18 = vpop.f32.mrf.mxu0 }
 0x1c2   : > { %v777_v20 = vmax.f32 %v629_v15, 0.0  ;;  %v669_v21 = vpop.f32.mrf.mxu1  ;;  %v651_v29 = vadd.f32 %v650_v18, %v2851_v46 }
 0x1c3   : > { %v780_v25 = vmax.f32 %v686_v17, 0.0  ;;  %v670_v31 = vadd.f32 %v669_v21, %v2860_v49 }
 0x1c4   : > { %v801_v26 = vpack.c.bf16 %v777_v20, %v769_v19  ;;  %v786_v36 = vmax.f32 %v651_v29, 0.0 }
 0x1c5   : > { %v804_v27 = vpack.c.bf16 %v780_v25, %v772_v24  ;;  %v787_v38 = vmax.f32 %v670_v31, 0.0 }
 0x1c6   : > { %1337 = vmatmul.bf16.vlgmr.msrb.gmra.mxu3 %v801_v26 }
 0x1c7   : > { %1394 = vmatmul.bf16.vlgmr.msra.gmra.mxu2 %v804_v27  ;;  %v631_v28 = vpop.f32.mrf.mxu3 }
 0x1c8   : > { %v688_v30 = vpop.f32.mrf.mxu2  ;;  %v632_v40 = vadd.f32 %v631_v28, %v2877_v57 }
 0x1c9   : > { %v652_v32 = vpop.f32.mrf.mxu0  ;;  %v689_v43 = vadd.f32 %v688_v30, %v477_v62 }
 0x1ca   : > { %v653_v33 = vadd.f32 %v652_v32, %v2851_v46  ;;  %v671_v34 = vpop.f32.mrf.mxu1  ;;  %v785_v51 = vmax.f32 %v632_v40, 0.0 }
 0x1cb   : > { %v672_v35 = vadd.f32 %v671_v34, %v2860_v49  ;;  %v788_v53 = vmax.f32 %v689_v43, 0.0 }
 0x1cc   : > { %v794_v37 = vmax.f32 %v653_v33, 0.0 }
 0x1cd   : > { %v795_v39 = vmax.f32 %v672_v35, 0.0 }
 0x1ce   : > { %v810_v42 = vpack.c.bf16 %v794_v37, %v786_v36 }
 0x1cf   : > { %v633_v44 = vpop.f32.mrf.mxu3  ;;  %v811_v45 = vpack.c.bf16 %v795_v39, %v787_v38 }
 0x1d0   : > { %v634_v47 = vadd.f32 %v633_v44, %v2877_v57  ;;  %v690_v48 = vpop.f32.mrf.mxu2  ;;  %1361 = vmatmul.bf16.gmra.mxu0 %v810_v42 }
 0x1d1   : > { %v691_v50 = vadd.f32 %v690_v48, %v477_v62  ;;  %1380 = vmatmul.bf16.gmra.mxu1 %v811_v45  ;;  %v721_v46 = vpop.f32.mrf.mxu0  ;;  %v478_v62 = vperm.slane %v2842_v41, 4 }
 0x1d2   : > { %v793_v52 = vmax.f32 %v634_v47, 0.0  ;;  %v740_v49 = vpop.f32.mrf.mxu1  ;;  %v722_v57 = vadd.f32 %v721_v46, %v479_v55 }
 0x1d3   : > { %v796_v54 = vmax.f32 %v691_v50, 0.0  ;;  %v741_v60 = vadd.f32 %v740_v49, %v480_v10 }
 0x1d4   : > { %v809_v56 = vpack.c.bf16 %v793_v52, %v785_v51  ;;  %v774_v3 = vmax.f32 %v722_v57, 0.0 }
 0x1d5   : > { %v812_v14 = vpack.c.bf16 %v796_v54, %v788_v53  ;;  %v775_v5 = vmax.f32 %v741_v60, 0.0 }
 0x1d6   : > { %1342 = vmatmul.bf16.gmra.mxu3 %v809_v56 }
 0x1d7   : > { %1399 = vmatmul.bf16.gmra.mxu2 %v812_v14  ;;  %v702_v58 = vpop.f32.mrf.mxu3 }
 0x1d8   : > { %v759_v59 = vpop.f32.mrf.mxu2  ;;  %v703_v7 = vadd.f32 %v702_v58, %v478_v62 }
 0x1d9   : > { %v723_v61 = vpop.f32.mrf.mxu0  ;;  %v760_v9 = vadd.f32 %v759_v59, %v481_v1 }
 0x1da   : > { %v724_v63 = vadd.f32 %v723_v61, %v479_v55  ;;  %v742_v0 = vpop.f32.mrf.mxu1  ;;  %v773_v18 = vmax.f32 %v703_v7, 0.0 }
 0x1db   : > { %v743_v2 = vadd.f32 %v742_v0, %v480_v10  ;;  %v776_v41 = vmax.f32 %v760_v9, 0.0 }
 0x1dc   : > { %v782_v4 = vmax.f32 %v724_v63, 0.0 }
 0x1dd   : > { %v783_v6 = vmax.f32 %v743_v2, 0.0 }
 0x1de   : > { %v806_v8 = vpack.c.bf16 %v782_v4, %v774_v3 }
 0x1df   : > { %v807_v11 = vpack.c.bf16 %v783_v6, %v775_v5  ;;  %v704_v12 = vpop.f32.mrf.mxu3 }
 0x1e0   : > { %v705_v13 = vadd.f32 %v704_v12, %v478_v62  ;;  %v761_v15 = vpop.f32.mrf.mxu2  ;;  %1432 = vmatmul.bf16.vlgmr.msra.gmra.mxu0 %v806_v8 }
 0x1e1   : > { %v762_v16 = vadd.f32 %v761_v15, %v481_v1  ;;  %1451 = vmatmul.bf16.vlgmr.msra.gmra.mxu1 %v807_v11  ;;  %v726_v17 = vpop.f32.mrf.mxu0 }
 0x1e2   : > { %v781_v19 = vmax.f32 %v705_v13, 0.0  ;;  %v745_v20 = vpop.f32.mrf.mxu1  ;;  %v727_v25 = vadd.f32 %v726_v17, %v479_v55 }
 0x1e3   : > { %v784_v21 = vmax.f32 %v762_v16, 0.0  ;;  %v746_v27 = vadd.f32 %v745_v20, %v480_v10 }
 0x1e4   : > { %v805_v22 = vpack.c.bf16 %v781_v19, %v773_v18  ;;  %v790_v32 = vmax.f32 %v727_v25, 0.0 }
 0x1e5   : > { %v808_v23 = vpack.c.bf16 %v784_v21, %v776_v41  ;;  %v791_v34 = vmax.f32 %v746_v27, 0.0 }
 0x1e6   : > { %1413 = vmatmul.bf16.vlgmr.msra.gmra.mxu3 %v805_v22 }
 0x1e7   : > { %1470 = vmatmul.bf16.vlgmr.msrb.gmra.mxu2 %v808_v23  ;;  %v707_v24 = vpop.f32.mrf.mxu3 }
 0x1e8   : > { %v764_v26 = vpop.f32.mrf.mxu2  ;;  %v708_v36 = vadd.f32 %v707_v24, %v478_v62 }
 0x1e9   : > { %v728_v28 = vpop.f32.mrf.mxu0  ;;  %v765_v38 = vadd.f32 %v764_v26, %v481_v1 }
 0x1ea   : > { %v729_v29 = vadd.f32 %v728_v28, %v479_v55  ;;  %v747_v30 = vpop.f32.mrf.mxu1  ;;  %v789_v45 = vmax.f32 %v708_v36, 0.0 }
 0x1eb   : > { %v748_v31 = vadd.f32 %v747_v30, %v480_v10  ;;  %v792_v48 = vmax.f32 %v765_v38, 0.0 }
 0x1ec   : > { %v798_v33 = vmax.f32 %v729_v29, 0.0 }
 0x1ed   : > { %v799_v35 = vmax.f32 %v748_v31, 0.0 }
 0x1ee   : > { %v814_v37 = vpack.c.bf16 %v798_v33, %v790_v32 }
 0x1ef   : > { %v709_v39 = vpop.f32.mrf.mxu3  ;;  %v815_v40 = vpack.c.bf16 %v799_v35, %v791_v34 }
 0x1f0   : > { %v710_v42 = vadd.f32 %v709_v39, %v478_v62  ;;  %v766_v43 = vpop.f32.mrf.mxu2  ;;  %1437 = vmatmul.bf16.gmra.mxu0 %v814_v37 }
 0x1f1   : > { %v767_v44 = vadd.f32 %v766_v43, %v481_v1  ;;  %1456 = vmatmul.bf16.gmra.mxu1 %v815_v40 }
 0x1f2   : > { %v797_v47 = vmax.f32 %v710_v42, 0.0 }
 0x1f3   : > { %v800_v50 = vmax.f32 %v767_v44, 0.0 }
 0x1f4   : > { %v813_v46 = vpack.c.bf16 %v797_v47, %v789_v45 }
 0x1f5   : > { %v816_v51 = vpack.c.bf16 %v800_v50, %v792_v48 }
 0x1f6   : > { %1418 = vmatmul.bf16.gmra.mxu3 %v813_v46  ;;  %v2258_v46 = vld [vmem:[%s2985_s3] sm:$0xff] }
 0x1f7   : > { %1475 = vmatmul.bf16.gmra.mxu2 %v816_v51 }
 0x23d   : > { %v1357_v52 = vpop.f32.mrf.mxu0 }
 0x23e   : > { %v1376_v49 = vpop.f32.mrf.mxu1 }
 0x245   : > { %v1359_v53 = vpop.f32.mrf.mxu0 }
 0x246   : > { %v1378_v54 = vpop.f32.mrf.mxu1 }
 0x249   : > { %v1338_v55 = vpop.f32.mrf.mxu3 }
 0x24a   : > { %v1395_v56 = vpop.f32.mrf.mxu2  ;;  %v1358_v0 = vadd.f32 %v1357_v52, %v1338_v55  ;;  %v2259_v52 = vld [vmem:[%s2985_s3 + $0x8] sm:$0xff]  ;;  %v2261_v55 = vld [vmem:[%s2985_s3 + $0x18] sm:$0xff] }
 0x24c   : > { %v1377_v3 = vadd.f32 %v1376_v49, %v1358_v0 }
 0x24d   : > { %v1362_v10 = vpop.f32.mrf.mxu0 }
 0x24e   : > { %v1381_v57 = vpop.f32.mrf.mxu1  ;;  %v1396_v7 = vadd.f32 %v1395_v56, %v1377_v3 }
 0x251   : > { %v1340_v14 = vpop.f32.mrf.mxu3 }
 0x252   : > { %v1397_v58 = vpop.f32.mrf.mxu2  ;;  %v1360_v5 = vadd.f32 %v1359_v53, %v1340_v14  ;;  %v2260_v53 = vld [vmem:[%s2985_s3 + $0x10] sm:$0xff]  ;;  %v2263_v14 = vld [vmem:[%s2985_s3 + $0x28] sm:$0xff] }
 0x254   : > { %v1379_v9 = vadd.f32 %v1378_v54, %v1360_v5 }
 0x255   : > { %v1364_v61 = vpop.f32.mrf.mxu0 }
 0x256   : > { %v1383_v62 = vpop.f32.mrf.mxu1  ;;  %v1398_v13 = vadd.f32 %v1397_v58, %v1379_v9 }
 0x259   : > { %v1343_v59 = vpop.f32.mrf.mxu3 }
 0x25a   : > { %v1400_v60 = vpop.f32.mrf.mxu2  ;;  %v1363_v18 = vadd.f32 %v1362_v10, %v1343_v59  ;;  %v2262_v10 = vld [vmem:[%s2985_s3 + $0x20] sm:$0xff] }
 0x25c   : > { %v1382_v22 = vadd.f32 %v1381_v57, %v1363_v18 }
 0x25d   : > { %v1433_v2 = vpop.f32.mrf.mxu0 }
 0x25e   : > { %v1452_v4 = vpop.f32.mrf.mxu1  ;;  %v1401_v29 = vadd.f32 %v1400_v60, %v1382_v22 }
 0x261   : > { %v1345_v63 = vpop.f32.mrf.mxu3 }
 0x262   : > { %v1402_v1 = vpop.f32.mrf.mxu2  ;;  %v1365_v24 = vadd.f32 %v1364_v61, %v1345_v63 }
 0x264   : > { %v1384_v32 = vadd.f32 %v1383_v62, %v1365_v24  ;;  %v1621_v62 = vstv %s1620_s18 }
 0x265   : > { %v1435_v12 = vpop.f32.mrf.mxu0 }
 0x266   : > { %v1454_v16 = vpop.f32.mrf.mxu1  ;;  %v1403_v35 = vadd.f32 %v1402_v1, %v1384_v32 }
 0x269   : > { %v1414_v6 = vpop.f32.mrf.mxu3 }
 0x26a   : > { %v1471_v8 = vpop.f32.mrf.mxu2  ;;  %v1415_v11 = vadd.f32 %v1414_v6, %v1396_v7 }
 0x26c   : > { %v1434_v15 = vadd.f32 %v1433_v2, %v1415_v11 }
 0x26d   : > { %v1438_v27 = vpop.f32.mrf.mxu0 }
 0x26e   : > { %v1453_v41 = vadd.f32 %v1452_v4, %v1434_v15  ;;  %v1457_v31 = vpop.f32.mrf.mxu1 }
 0x270   : > { %v1472_v25 = vadd.f32 %v1471_v8, %v1453_v41 }
 0x271   : > { %v1416_v17 = vpop.f32.mrf.mxu3 }
 0x272   : > { %v1417_v19 = vadd.f32 %v1416_v17, %v1398_v13  ;;  %v1473_v20 = vpop.f32.mrf.mxu2 }
 0x274   : > { %v1436_v21 = vadd.f32 %v1435_v12, %v1417_v19 }
 0x275   : > { %v1440_v39 = vpop.f32.mrf.mxu0 }
 0x276   : > { %v1455_v23 = vadd.f32 %v1454_v16, %v1436_v21  ;;  %v1459_v43 = vpop.f32.mrf.mxu1 }
 0x278   : > { %v1474_v26 = vadd.f32 %v1473_v20, %v1455_v23 }
 0x279   : > { %v1419_v28 = vpop.f32.mrf.mxu3 }
 0x27a   : > { %v1481_v30 = vpack.c.bf16 %v1474_v26, %v1472_v25  ;;  %v1420_v33 = vadd.f32 %v1419_v28, %v1401_v29  ;;  %v1476_v34 = vpop.f32.mrf.mxu2 }
 0x27c   : > { %1585 = vrot.lane.b32.xlu1 %v1481_v30, %s2398_s19  ;;  %v1439_v36 = vadd.f32 %v1438_v27, %v1420_v33 }
 0x27e   : > { %v1458_v40 = vadd.f32 %v1457_v31, %v1439_v36 }
 0x280   : > { %v1477_v47 = vadd.f32 %v1476_v34, %v1458_v40 }
 0x281   : > { %v1421_v37 = vpop.f32.mrf.mxu3 }
 0x282   : > { %v1422_v38 = vadd.f32 %v1421_v37, %v1403_v35  ;;  %v1478_v45 = vpop.f32.mrf.mxu2 }
 0x284   : > { %v1441_v42 = vadd.f32 %v1440_v39, %v1422_v38 }
 0x286   : > { %v1460_v44 = vadd.f32 %v1459_v43, %v1441_v42 }
 0x288   : > { %v1479_v48 = vadd.f32 %v1478_v45, %v1460_v44 }
 0x28a   : > { %v1482_v50 = vpack.c.bf16 %v1479_v48, %v1477_v47 }
 0x28c   : > { %1587 = vrot.lane.b32.xlu0 %v1482_v50, %s2398_s19  ;;  %1506 = vrot.lane.b32.xlu2 %v1482_v50, %s2399_s20  ;;  %s271_s19 = sand.u32 1, %s2386_s27  }
 0x28d   : > { %1557 = vmatpush.bf16.msrb.mxu0 %v1482_v50  ;;  %s1631_s6 = scalar_lea.sflag [#allocation4], %s271_s19 }
 0x291   : > { %1558 = vmatpush.bf16.msrb.mxu0 %v1481_v30 }
 0x294   : > { %1504 = vrot.lane.b32.xlu2 %v1481_v30, %s2399_s20  ;;  %2143 = vmatmul.msk.bf16.vlgmr.msrb.gmra.mxu0 %vm441_vm1, %v2258_v46  ;;  %s1712_s20 = sshll.u32 %s271_s19, 5 }
 0x295   : > { %s273_s21 = scalar_lea.vmem [#allocation3], %s1712_s20 }
 0x296   : > { %s1643_s30 = sshll.u32 %s273_s21, 4  ;;  %s1644_s30 = int_to_ptr.vmem [resolvable:$true] %s1643_s30 }
 0x2a4   : > { %2144 = vmatmul.msk.bf16.gmra.mxu0 %vm441_vm1, %v2259_v52 }
 0x2e6   : > { %v1507_v51 = vpop.permute.xlu2 %1506 }
 0x2e7   : > { %1522 = vmatpush.bf16.msrb.mxu3 %v1507_v51 }
 0x2ee   : > { %v1505_v49 = vpop.permute.xlu2 %1504  ;;  %v1586_v56 = vpop.permute.xlu1 %1585 }
 0x2ef   : > { %1523 = vmatpush.bf16.msrb.mxu3 %v1505_v49 }
 0x2f2   : > { %2133 = vmatmul.msk.bf16.vlgmr.msrb.gmra.mxu3 %vm441_vm1, %v2260_v53 }
 0x2fe   : > { %v1588_v54 = vpop.permute.xlu0 %1587 }
 0x2ff   : > { %1603 = vmatpush.bf16.msrb.mxu1 %v1588_v54 }
 0x302   : > { %2134 = vmatmul.msk.bf16.gmra.mxu3 %vm441_vm1, %v2261_v55 }
 0x303   : > { %1604 = vmatpush.bf16.msrb.mxu1 %v1586_v56 }
 0x306   : > { %2157 = vmatmul.msk.bf16.vlgmr.msrb.gmra.mxu1 %vm441_vm1, %v2262_v10 }
 0x311   : > { %v1560_v58 = vpop.f32.mrf.mxu0 }
 0x316   : > { %2158 = vmatmul.msk.bf16.gmra.mxu1 %vm441_vm1, %v2263_v14 }
 0x319   : > { %v1562_v60 = vpop.f32.mrf.mxu0 }
 0x321   : > { %v1565_v6 = vpop.f32.mrf.mxu0 }
 0x329   : > { %v1567_v15 = vpop.f32.mrf.mxu0 }
 0x375   : > { %v1525_v57 = vpop.f32.mrf.mxu3 }
 0x376   : > { %v1561_v59 = vadd.f32 %v1560_v58, %v1525_v57 }
 0x37d   : > { %v1527_v63 = vpop.f32.mrf.mxu3 }
 0x37e   : > { %v1563_v2 = vadd.f32 %v1562_v60, %v1527_v63 }
 0x383   : > { %v1606_v61 = vpop.f32.mrf.mxu1 }
 0x384   : > { %v1616_v0 = vadd.f32 %v1606_v61, %v1561_v59 }
 0x385   : > { %v1530_v5 = vpop.f32.mrf.mxu3 }
 0x386   : > { %v1622_v1 = vadd.f32 %v1621_v62, %v1616_v0  ;;  %v1566_v8 = vadd.f32 %v1565_v6, %v1530_v5 }
 0x388   : > { %1626 = vst.msk [vmem:[%s273_s21] sm:$0xff] %vm441_vm1, %v1622_v1 }
 0x38b   : > { %v1608_v3 = vpop.f32.mrf.mxu1 }
 0x38c   : > { %v1617_v4 = vadd.f32 %v1608_v3, %v1563_v2 }
 0x38d   : > { %v1532_v13 = vpop.f32.mrf.mxu3 }
 0x38e   : > { %v1623_v7 = vadd.f32 %v1621_v62, %v1617_v4  ;;  %v1568_v16 = vadd.f32 %v1567_v15, %v1532_v13 }
 0x390   : > { %1627 = vst.msk [vmem:[%s273_s21 + $0x8] sm:$0xff] %vm441_vm1, %v1623_v7 }
 0x393   : > { %v1611_v9 = vpop.f32.mrf.mxu1 }
 0x394   : > { %v1618_v11 = vadd.f32 %v1611_v9, %v1566_v8 }
 0x396   : > { %v1624_v12 = vadd.f32 %v1621_v62, %v1618_v11 }
 0x398   : > { %1628 = vst.msk [vmem:[%s273_s21 + $0x10] sm:$0xff] %vm441_vm1, %v1624_v12 }
 0x39b   : > { %v1613_v17 = vpop.f32.mrf.mxu1 }
 0x39c   : > { %v1619_v18 = vadd.f32 %v1613_v17, %v1568_v16 }
 0x39e   : > { %v1625_v19 = vadd.f32 %v1621_v62, %v1619_v18 }
 0x3a0   : > { %1629 = vst.msk [vmem:[%s273_s21 + $0x18] sm:$0xff] %vm441_vm1, %v1625_v19 }
 0x3a1   : > { %2359 = shalt.err (!%p2356_p3)
}
 0x3a2   : > { %s2400_s19 = smov 128   ;;  %s2401_s21 = smov 8  }
 0x3a3   : > { %2267 = dma.vmem_to_hbm [thread:$0]  (%p2483_p5), %s1644_s30, 512, %s1646_s9, %s1631_s6, %s2400_s19, %s2400_s19, %s2401_s21  }
 0x3a4 PF: > { %p2273_p4 = scmp.ge.s32.totalorder %s2394_s29, 2  ;;  %s1660_s22 = sand.u32 1, %s2382_s26  }
 0x3a5   : > { %s1661_s23 = scalar_lea.sflag [#allocation4], %s1660_s22 }
 0x3a6   : > { %p2270_p7 = pnand %p2273_p4, %p2487_p6 }
 0x3a8   : > { %p2271_p8 = pneg %p2270_p7 }
 0x3aa   : > { %2377 = dma.done.wait (%p2271_p8), %s1661_s23, 512  }
 0x3ab   : > { %2379 = vsyncadd (%p2271_p8), %s1661_s23, 4294966784  ;;  %p18_p9 = scmp.ge.s32.totalorder %s2470_s8, 4   ;;  %s2992_s26 = smov %s2386_s27 }
 0x3ac   : > { %s2993_s27 = smov %s2390_s28  ;;  %s2994_s28 = smov %s2481_s11 }
 0x3ad   : > { %s2995_s29 = smov %s2470_s8  ;;  %20 = sbr.rel (!%p18_p9) target bundleno = 5 (0x5), region = 87 }
 0x3b2   :  { %1667 = vsyncpa [#allocation4], 1 }
 0x3b3   :  { %1669 = vsyncpa [#allocation4 + $0x1], 1 }

</bundles_post_ra>
